<compile_context>
chip_gen: v7x
topology: tpu7x:2x2x1
jax: 0.10.0
libtpu: 0.0.40
codegen_flags: <defaults>
</compile_context>

<pallas_src>
import jax
import jax.numpy as jnp
from jax.experimental import pallas as pl
from jax.experimental.pallas import tpu as pltpu


# ----------------------------- parameter setup ------------------------------
def make_position_embedding(d_model: int, max_seq_len: int,
                            dtype=jnp.float32) -> jnp.ndarray:
    """Sinusoidal PE buffer, exactly as the PyTorch __init__ builds it.

    The (optional) dtype cast happens here, once, so the forward pass never
    pays for a slice/cast copy outside the kernel."""
    position = jnp.arange(0, max_seq_len, dtype=jnp.float32)[:, None]            # (L, 1)
    div_term = jnp.exp(
        jnp.arange(0, d_model, 2, dtype=jnp.float32)
        * (-jnp.log(jnp.float32(10000.0)) / d_model)
    )                                                                             # (D/2,)
    angles = position * div_term                                                  # (L, D/2)
    pe = jnp.zeros((max_seq_len, d_model), dtype=jnp.float32)
    pe = pe.at[:, 0::2].set(jnp.sin(angles))
    pe = pe.at[:, 1::2].set(jnp.cos(angles))
    return pe[None, :, :].astype(dtype)                                           # (1, L, D)


# --------------------------------- kernel -----------------------------------
def _add_pe_kernel(x_ref, pe_ref, o_ref):
    # Elementwise add; the pe block broadcasts over the leading (batch) block dim.
    # Computed in the promoted dtype, stored in the output dtype.
    o_ref[...] = (x_ref[...] + pe_ref[...]).astype(o_ref.dtype)


# ------------------------------ tiling helpers ------------------------------
# Per-grid-step byte budget for ONE copy of (x block + pe block + out block).
# Double-buffering doubles it (~24 MiB live), which fits under the 48 MiB
# scoped-VMEM limit we request — safe on v7x (64 MiB physical) and trivially
# safe on v5e/v6e (128 MiB physical).
_STEP_BYTES = 12 << 20
_VMEM_LIMIT_BYTES = 48 << 20


def _round_down(value: int, multiple: int) -> int:
    """Largest multiple of `multiple` that is <= value (but at least `multiple`)."""
    return max(multiple, (value // multiple) * multiple)


def _sublane_multiple(dtype) -> int:
    """Sublane packing granularity: 8 rows f32, 16 bf16, 32 int8/fp8."""
    return max(8, 32 // max(1, jnp.dtype(dtype).itemsize))


def _compiler_params(semantics):
    return pltpu.CompilerParams(
        dimension_semantics=semantics,
        vmem_limit_bytes=_VMEM_LIMIT_BYTES,
    )


# ------------------------------- forward pass -------------------------------
def position_embedding_forward(x: jnp.ndarray, pe: jnp.ndarray, *,
                               step_bytes: int = _STEP_BYTES) -> jnp.ndarray:
    """X + pe[:, :S] with the broadcasted add running inside a Pallas TPU kernel."""
    B, S, D = x.shape
    max_seq_len = pe.shape[1]
    if S > max_seq_len:
        raise ValueError(f"seq_len {S} exceeds max_seq_len {max_seq_len}")
    if D != pe.shape[2]:
        raise ValueError(f"d_model mismatch: x has {D}, pe has {pe.shape[2]}")

    out_dtype = jnp.result_type(x.dtype, pe.dtype)     # matches torch promotion
    xb = jnp.dtype(x.dtype).itemsize
    pb = jnp.dtype(pe.dtype).itemsize
    ob = jnp.dtype(out_dtype).itemsize
    sub = max(_sublane_multiple(x.dtype), _sublane_multiple(pe.dtype),
              _sublane_multiple(out_dtype))

    if D % 128 == 0:
        # ---------------- lane-dense path: keep (B, S, D) layout ----------------
        # Bytes per sequence-row when the whole batch is folded into one block.
        folded_row_bytes = D * (B * xb + pb + B * ob)
        fold_batch = folded_row_bytes * sub <= step_bytes
        row_bytes = folded_row_bytes if fold_batch else D * (xb + pb + ob)

        ts = _round_down(step_bytes // row_bytes, sub)   # bytes drive the tile (no row cap)
        pe_in = pe                                       # full table, no slice/cast copy
        if ts >= S:
            ts = S
            if S % 8 != 0 and S != max_seq_len:
                # Block must be (8k, 128k) or full-extent; slice so it IS full-extent.
                pe_in = pe[:, :S, :]
        ns = pl.cdiv(S, ts)                              # partial last block is fine

        if fold_batch:
            # One grid step covers all batches: B× fewer steps, pe read once per step.
            return pl.pallas_call(
                _add_pe_kernel,
                out_shape=jax.ShapeDtypeStruct((B, S, D), out_dtype),
                grid=(ns,),
                in_specs=[
                    pl.BlockSpec((B, ts, D), lambda s: (0, s, 0)),   # x
                    pl.BlockSpec((1, ts, D), lambda s: (0, s, 0)),   # pe (broadcast in-kernel)
                ],
                out_specs=pl.BlockSpec((B, ts, D), lambda s: (0, s, 0)),
                compiler_params=_compiler_params(("parallel",)),
            )(x, pe_in)

        # B*D too large to fold: one batch row per step; s outermost, b innermost so
        # pe's block index is constant along the inner axis (one fetch per S-tile).
        x_spec = pl.BlockSpec((1, ts, D), lambda s, b: (b, s, 0))
        o_spec = pl.BlockSpec((1, ts, D), lambda s, b: (b, s, 0))
        pe_map = lambda s, b: (0, s, 0)

        def _run(pe_spec):
            return pl.pallas_call(
                _add_pe_kernel,
                out_shape=jax.ShapeDtypeStruct((B, S, D), out_dtype),
                grid=(ns, B),
                in_specs=[x_spec, pe_spec],
                out_specs=o_spec,
                compiler_params=_compiler_params(("parallel", "parallel")),
            )(x, pe_in)

        try:
            # pe's block index does not change along the inner batch axis, so a single
            # buffer suffices (one short, well-hidden fetch per S-tile); the freed VMEM
            # goes to the x/out tiles.
            return _run(pl.BlockSpec((1, ts, D), pe_map, pipeline_mode=pl.Buffered(1)))
        except Exception:
            # Compatibility fallback if this jax build rejects single-buffer pipelining.
            return _run(pl.BlockSpec((1, ts, D), pe_map))

    # ---------------- fallback: D % 128 != 0 — fold (S, D) into one lane axis ----------------
    F = S * D
    x2 = x.reshape(B, F)
    pe2 = pe[:, :S, :].reshape(1, F)                     # glue reshape outside the kernel

    # VMEM accounting with sublane padding: a (B, tf) block physically occupies
    # round_up(B, sub) sublanes, and the (1, tf) pe block occupies `sub` sublanes.
    rows_x = -(-B // sub) * sub
    rows_pe = sub
    lane_bytes = rows_x * (xb + ob) + rows_pe * pb       # bytes per lane column per step
    if F <= 128:
        tf = F                                           # full-extent block (always legal)
    else:
        tf = min(_round_down(step_bytes // lane_bytes, 128), _round_down(F, 128))
    nf = pl.cdiv(F, tf)                                  # partial last block kept pipelined

    out2 = pl.pallas_call(
        _add_pe_kernel,
        out_shape=jax.ShapeDtypeStruct((B, F), out_dtype),
        grid=(nf,),
        in_specs=[
            pl.BlockSpec((B, tf), lambda f: (0, f)),     # x: all batches per lane tile
            pl.BlockSpec((1, tf), lambda f: (0, f)),     # pe: broadcast inside the kernel
        ],
        out_specs=pl.BlockSpec((B, tf), lambda f: (0, f)),
        compiler_params=_compiler_params(("parallel",)),
    )(x2, pe2)
    return out2.reshape(B, S, D)


# ----------------------------------- tests -----------------------------------
if __name__ == "__main__":
    key = jax.random.PRNGKey(0)
    k1, k2, k3 = jax.random.split(key, 3)

    # Test 1: small shape with D < 128 -> folded lane-axis fallback path.
    d_model, max_seq_len, batch, seq = 32, 16, 2, 8
    x1 = jax.random.normal(k1, (batch, seq, d_model), dtype=jnp.float32)
    pe1 = make_position_embedding(d_model, max_seq_len)
    out1 = jax.block_until_ready(position_embedding_forward(x1, pe1))
    ref1 = x1 + pe1[:, :seq, :]
    assert out1.shape == (batch, seq, d_model)
    assert jnp.allclose(out1, ref1, atol=1e-6, rtol=1e-6)

    # Test 2: D a multiple of 128 -> batch-folded (B, ts, D) path, full pe table passed.
    d_model2, max_seq_len2, batch2, seq2 = 128, 32, 2, 16
    x2 = jax.random.normal(k2, (batch2, seq2, d_model2), dtype=jnp.float32)
    pe2 = make_position_embedding(d_model2, max_seq_len2)
    out2 = jax.block_until_ready(position_embedding_forward(x2, pe2))
    ref2 = x2 + pe2[:, :seq2, :]
    assert out2.shape == (batch2, seq2, d_model2)
    assert jnp.allclose(out2, ref2, atol=1e-6, rtol=1e-6)

    # Test 3: force the per-batch (s, b) grid path (as used when B*D is huge) by
    # shrinking the per-step byte budget; exercises the single-buffered pe spec.
    out3 = jax.block_until_ready(
        position_embedding_forward(x2, pe2, step_bytes=4096))
    assert jnp.allclose(out3, ref2, atol=1e-6, rtol=1e-6)

    # Test 4: sequence length not a multiple of 8 (full-extent blocks + pe slice corner).
    seq4 = 5
    x4 = jax.random.normal(k3, (batch2, seq4, d_model2), dtype=jnp.float32)
    out4 = jax.block_until_ready(position_embedding_forward(x4, pe2))
    ref4 = x4 + pe2[:, :seq4, :]
    assert out4.shape == (batch2, seq4, d_model2)
    assert jnp.allclose(out4, ref4, atol=1e-6, rtol=1e-6)

    print("KERNEL_OK")
</pallas_src>

<mosaic_0001>
module attributes {stable_mosaic.version = 11 : i64} {
  func.func @_add_pe_kernel(%arg0: i32, %arg1: memref<2x256xf32, #tpu.memory_space<vmem>>, %arg2: memref<1x256xf32, #tpu.memory_space<vmem>>, %arg3: memref<2x256xf32, #tpu.memory_space<vmem>>) attributes {dimension_semantics = [#tpu.dimension_semantics<parallel>], iteration_bounds = array<i64: 1>, scalar_prefetch = 0 : i64, scratch_operands = 0 : i64, tpu.core_type = #tpu.core_type<tc>, window_params = [{transform_indices = @transform_0, window_bounds = array<i64: 2, 256>}, {transform_indices = @transform_1, window_bounds = array<i64: 1, 256>}, {transform_indices = @transform_2, window_bounds = array<i64: 2, 256>}]} {
    %c0 = arith.constant 0 : index
    %c0_0 = arith.constant 0 : index
    %0 = vector.load %arg1[%c0, %c0_0] : memref<2x256xf32, #tpu.memory_space<vmem>>, vector<2x256xf32>
    %c0_1 = arith.constant 0 : index
    %c0_2 = arith.constant 0 : index
    %1 = vector.load %arg2[%c0_1, %c0_2] : memref<1x256xf32, #tpu.memory_space<vmem>>, vector<1x256xf32>
    %2 = vector.broadcast %1 : vector<1x256xf32> to vector<2x256xf32>
    %3 = arith.addf %0, %2 : vector<2x256xf32>
    %c0_3 = arith.constant 0 : index
    %c0_4 = arith.constant 0 : index
    %4 = vector.load %arg3[%c0_3, %c0_4] : memref<2x256xf32, #tpu.memory_space<vmem>>, vector<2x256xf32>
    tpu.vector_store %arg3[%c0_3, %c0_4], %3 {strides = array<i32>} : memref<2x256xf32, #tpu.memory_space<vmem>>, vector<2x256xf32>,
    return
  }
  func.func @transform_0(%arg0: i32) -> (i32, i32) {
    %c0_i32 = arith.constant 0 : i32
    %c0_i32_0 = arith.constant 0 : i32
    return %c0_i32, %arg0 : i32, i32
  }
  func.func @transform_1(%arg0: i32) -> (i32, i32) {
    %c0_i32 = arith.constant 0 : i32
    %c0_i32_0 = arith.constant 0 : i32
    return %c0_i32, %arg0 : i32, i32
  }
  func.func @transform_2(%arg0: i32) -> (i32, i32) {
    %c0_i32 = arith.constant 0 : i32
    %c0_i32_0 = arith.constant 0 : i32
    return %c0_i32, %arg0 : i32, i32
  }
}

</mosaic_0001>

<bundles_post_ra>
// kernel: tpu_custom_call.1
= control target key start
LH: loop header
LB: loop body
LE: loop exit
PB: predicated region body
PF: predicated region fallthrough
CT: control target
= control target key end

     0   :  { %7 = vsyncpa [#allocation3], 0  ;;  %s157_s0 = inlined_call_operand.hbm [shape: f32[2,256], index: 0, kind: input, shape index: {}]   ;;  %s158_s1 = inlined_call_operand.vmem [shape: f32[1,256], index: 1, kind: input, shape index: {}]   ;;  %s159_s2 = inlined_call_operand.hbm [shape: f32[2,256], index: 2, kind: output, shape index: {}]  }
   0x1   :  { %8 = vsyncpa [#allocation4], 0  ;;  %s112_s9 = smov [#allocation2]   ;;  %s64_s13 = scalar_lea.hbm %s157_s0, 64 }
   0x2   :  { %s15_s10 = sshll.u32 %s112_s9, 4  ;;  %p65_p0 = scmp.ne.s32.totalorder %s157_s0, %s64_s13  ;;  %s16_s10 = int_to_ptr.vmem [resolvable:$true] %s15_s10 }
   0x3   :  { %p68_p1 = scmp.lt.u32.totalorder %s64_s13, %s157_s0 }
   0x5   :  { %p70_p2 = pnand %p68_p1, %p65_p0 }
   0x7   :  { %73 = shalt.err (!%p70_p2)
}
   0x8   :  { %s74_s18 = scalar_lea.vmem %s16_s10, 64  ;;  %p79_p4 = scmp.lt.s32.totalorder %s16_s10, %s16_s10 }
   0x9   :  { %p75_p3 = scmp.ne.s32.totalorder %s16_s10, %s74_s18  ;;  %p80_p5 = scmp.lt.s32.totalorder %s74_s18, %s74_s18 }
   0xb   :  { %p81_p6 = por %p80_p5, %p79_p4 }
   0xd   :  { %p82_p7 = pnand %p81_p6, %p75_p3 }
   0xf   :  { %85 = shalt.err (!%p82_p7)
}
  0x10   :  { %18 = dma.hbm_to_vmem [thread:$0]  %s157_s0, 64, %s16_s10, [#allocation3]  }
  0x11   :  { %108 = dma.done.wait [#allocation3], 64  }
  0x12   :  { %109 = vsyncadd [#allocation3], 4294967232  ;;  %v27_v0 = vlaneseq  ;;  %v113_v1 = vmov 1983009808   ;;  %v25_v7 = vld [vmem:[%s158_s1] sm:$0x3] }
  0x13   :  { %v37_v2 = vunpack.c.l.s4 %v113_v1  ;;  %v24_v12 = vld [vmem:[#allocation2] sm:$0xf]  ;;  %s114_s23 = smov [#allocation5]  }
  0x14   :  { %v28_v3 = vshrl.u32 %v27_v0, 7  ;;  %s52_s0 = sshll.u32 %s114_s23, 4  ;;  %s53_s0 = int_to_ptr.vmem [resolvable:$true] %s52_s0 }
  0x15   :  { %v38_v6 = vunpack.c.0.s8 %v37_v2  ;;  %s86_s24 = scalar_lea.vmem %s53_s0, 64  ;;  %p91_p9 = scmp.lt.s32.totalorder %s53_s0, %s53_s0 }
  0x16   :  { %v29_v4 = vsub.s32 0, %v28_v3  ;;  %v33_v5 = vsub.s32 1, %v28_v3  ;;  %p87_p8 = scmp.ne.s32.totalorder %s53_s0, %s86_s24  ;;  %p92_p10 = scmp.lt.s32.totalorder %s86_s24, %s86_s24 }
  0x17   :  { %v41_v10 = vsub.s32 %v38_v6, %v28_v3 }
  0x18   :  { %v30_v8 = vrot.slane %v25_v7, %v29_v4  ;;  %v34_v9 = vrot.slane %v25_v7, %v33_v5  ;;  %p93_p11 = por %p92_p10, %p91_p9 }
  0x1a   :  { %v35_v11 = vcombine.low %v30_v8, %v34_v9  ;;  %p94_p12 = pnand %p93_p11, %p87_p8 }
  0x1c   :  { %v42_v13 = vrot.slane %v35_v11, %v41_v10 }
  0x1e   :  { %v44_v14 = vadd.f32 %v42_v13, %v24_v12 }
  0x20   :  { %45 = vst [vmem:[#allocation5] sm:$0xf] %v44_v14 }
  0x21   :  { %97 = shalt.err (!%p94_p12)
}
  0x22   :  { %s98_s26 = scalar_lea.hbm %s159_s2, 64 }
  0x23   :  { %p99_p13 = scmp.ne.s32.totalorder %s159_s2, %s98_s26  ;;  %p102_p0 = scmp.lt.u32.totalorder %s98_s26, %s159_s2 }
  0x25   :  { %p104_p1 = pnand %p102_p0, %p99_p13 }
  0x27   :  { %107 = shalt.err (!%p104_p1)
}
  0x28   :  { %55 = dma.vmem_to_hbm [thread:$0]  %s53_s0, 64, %s159_s2, [#allocation4]  }
  0x29   :  { %110 = dma.done.wait [#allocation4], 64  }
  0x2a   :  { %111 = vsyncadd [#allocation4], 4294967232 }
  0x2b   :  { %59 = vsyncpa [#allocation3], 1 }
  0x2c   :  { %60 = vsyncpa [#allocation4], 1 }

</bundles_post_ra>
